<compile_context>
chip_gen: v7x
topology: tpu7x:2x2x1
jax: 0.10.0
libtpu: 0.0.40
codegen_flags: <defaults>
</compile_context>

<pallas_src>
import jax
import jax.numpy as jnp
import numpy as np
from jax.experimental import pallas as pl
from jax.experimental.pallas import tpu as pltpu


# ---------------------------------------------------------------------------
# lin1: Linear -> LayerNorm(no affine, eps=1e-5) -> SiLU        (one batch/step)
# ---------------------------------------------------------------------------
def _lin1_kernel(wT_ref, b_ref, s_ref, o_ref):
    # wT_ref : (H, H)   pre-transposed weight (y = x @ W.T == x @ wT)
    # b_ref  : (1, H)
    # s_ref  : (1, N, H)
    # o_ref  : (1, N, H)  float32 s'
    s = s_ref[0].astype(jnp.float32)                                # (N, H)
    y = jnp.dot(s, wT_ref[...], preferred_element_type=jnp.float32) + b_ref[...]
    mu = jnp.mean(y, axis=-1, keepdims=True)
    var = jnp.mean((y - mu) * (y - mu), axis=-1, keepdims=True)
    y = (y - mu) * jax.lax.rsqrt(var + 1e-5)
    y = y * jax.nn.sigmoid(y)                                       # SiLU
    o_ref[0] = y


# ---------------------------------------------------------------------------
# pair streaming, j-blocked:
#   acc[d, i, h] += sum_{j in chunk} ev[d, i, j] * (s'[j, h] * mask[i, j, h])
# ---------------------------------------------------------------------------
def _s2v_kernel(sp_ref, ev_ref, mask_ref, o_ref, acc_ref):
    # sp_ref  : (1, tj, H)       s' rows of this j-chunk (f32)
    # ev_ref  : (1, 3, tn, tj)   lane-dense unit-vector chunk
    # mask_ref: (1, tn, tj, H)
    # o_ref   : (1, 3, tn, H)    resident across j (same block index)
    # acc_ref : (3, tn, H)       f32 accumulator scratch
    j = pl.program_id(2)

    @pl.when(j == 0)
    def _():
        acc_ref[...] = jnp.zeros_like(acc_ref)

    sp = sp_ref[0].astype(jnp.float32)                              # (tj, H)
    m = mask_ref[0].astype(jnp.float32)                             # (tn, tj, H)
    t = sp[None, :, :] * m                                          # (tn, tj, H)

    # Unrolled d-contraction: VPU multiply + small per-chunk j-reduce, f32 acc.
    # TODO(synk): on v6e/v7x keep this multiply in bf16 (f32 accumulate) when
    # mask/ev arrive in bf16, to keep the VPU off the critical path at 3.2 TB/s.
    for d in range(3):
        evd = ev_ref[0, d].astype(jnp.float32)                      # (tn, tj)
        acc_ref[d] += jnp.sum(evd[:, :, None] * t, axis=1)          # (tn, H)

    @pl.when(j == pl.num_programs(2) - 1)
    def _():
        o_ref[0] = acc_ref[...].astype(o_ref.dtype)


# ---------------------------------------------------------------------------
# VMEM-aware tiling helpers
# ---------------------------------------------------------------------------
_TILE_CANDS = (512, 256, 128, 64, 32, 16, 8)


def _divisors(n, cap):
    """Sublane-aligned divisors of n (descending), capped; fall back to n itself."""
    out = [c for c in _TILE_CANDS if c <= cap and n % c == 0]
    return out if out else [n]


def _stage2_step_bytes(tn, tj, H, mask_isz, ev_isz, sp_isz, out_isz):
    mask_blk = tn * tj * H * mask_isz
    ev_blk = 3 * tn * tj * ev_isz
    sp_blk = tj * H * sp_isz
    out_blk = 3 * tn * H * out_isz
    acc = 3 * tn * H * 4
    interm = 3 * tn * tj * H * 4      # t + per-d product temporaries (f32, generous)
    return 2 * (mask_blk + ev_blk + sp_blk + out_blk) + acc + interm


def _pick_tiles(N, H, mask_isz, ev_isz, sp_isz, out_isz, budget):
    tn_cands = _divisors(N, 128)
    tj_cands = _divisors(N, 512)
    best = None
    for tn in tn_cands:
        for tj in tj_cands:
            need = _stage2_step_bytes(tn, tj, H, mask_isz, ev_isz, sp_isz, out_isz)
            if need <= budget:
                key = (tn * tj, tj)            # biggest tile; prefer long j-chunks
                if best is None or key > best[0]:
                    best = (key, tn, tj)
    if best is None:
        return tn_cands[-1], tj_cands[-1]      # smallest legal tiles
    return best[1], best[2]


def _default_vmem_limit():
    """~48 MiB on v7x (64 MiB physical), ~96 MiB on v5e/v6e (128 MiB physical)."""
    cap = 128 * 1024 * 1024
    try:
        cap = int(pltpu.get_tpu_info().vmem_capacity_bytes)
    except Exception:
        pass
    return min(cap * 3 // 4, 100 * 1024 * 1024)


# ---------------------------------------------------------------------------
# wrapper
# ---------------------------------------------------------------------------
def cfconv_s2v(s, ev, mask, weight, bias, *, tn=None, tj=None, vmem_limit_bytes=None):
    B, N, H = s.shape
    assert ev.shape == (B, N, N, 3)
    assert mask.shape == (B, N, N, H)
    assert weight.shape == (H, H) and bias.shape == (H,)
    # TODO(synk): production models should use H a multiple of 128 for fully
    # lane-dense mask/output tiles; small H stays legal here via full-extent
    # last-dim blocks (padding mask in the wrapper would inflate HBM traffic).

    if vmem_limit_bytes is None:
        vmem_limit_bytes = _default_vmem_limit()
    vmem_limit_bytes = int(vmem_limit_bytes)

    out_dtype = s.dtype
    if tn is None or tj is None:
        a_tn, a_tj = _pick_tiles(
            N, H,
            mask.dtype.itemsize, ev.dtype.itemsize,
            4, np.dtype(out_dtype).itemsize,
            budget=vmem_limit_bytes * 9 // 10)
        tn = a_tn if tn is None else tn
        tj = a_tj if tj is None else tj
    assert N % tn == 0 and N % tj == 0, "tn/tj must divide N"

    wT = weight.T                        # pre-transpose once (no in-kernel .T)
    bias2d = bias.reshape(1, H)

    # ---- stage 1: s' = SiLU(LayerNorm(s @ W.T + b)) ----
    sp = pl.pallas_call(
        _lin1_kernel,
        out_shape=jax.ShapeDtypeStruct((B, N, H), jnp.float32),
        grid_spec=pltpu.PrefetchScalarGridSpec(
            num_scalar_prefetch=0,
            grid=(B,),
            in_specs=[
                pl.BlockSpec((H, H), lambda b: (0, 0)),          # W.T
                pl.BlockSpec((1, H), lambda b: (0, 0)),          # bias
                pl.BlockSpec((1, N, H), lambda b: (b, 0, 0)),    # s
            ],
            out_specs=pl.BlockSpec((1, N, H), lambda b: (b, 0, 0)),
        ),
        compiler_params=pltpu.CompilerParams(
            dimension_semantics=("parallel",)),
    )(wT, bias2d, s)

    # ---- stage 2: stream pairs, tiled over output rows i and neighbors j ----
    ev_t = jnp.transpose(ev, (0, 3, 1, 2))   # (B, 3, N, N), lane-dense last dim

    flops = 7 * B * N * N * H                          # 1 mul + 3*(mul+add) per pair-elem
    bytes_accessed = (mask.size * mask.dtype.itemsize
                      + ev.size * ev.dtype.itemsize
                      + (N // tn) * B * N * H * 4      # s' re-read per i-tile
                      + B * 3 * N * H * np.dtype(out_dtype).itemsize)

    v_dnh = pl.pallas_call(
        _s2v_kernel,
        out_shape=jax.ShapeDtypeStruct((B, 3, N, H), out_dtype),
        grid_spec=pltpu.PrefetchScalarGridSpec(
            num_scalar_prefetch=0,
            grid=(B, N // tn, N // tj),
            in_specs=[
                pl.BlockSpec((1, tj, H), lambda b, i, j: (b, j, 0)),          # s'
                pl.BlockSpec((1, 3, tn, tj), lambda b, i, j: (b, 0, i, j)),   # ev (B,3,N,N)
                pl.BlockSpec((1, tn, tj, H), lambda b, i, j: (b, i, j, 0)),   # mask
            ],
            out_specs=pl.BlockSpec((1, 3, tn, H), lambda b, i, j: (b, 0, i, 0)),
            scratch_shapes=[pltpu.VMEM((3, tn, H), jnp.float32)],
        ),
        compiler_params=pltpu.CompilerParams(
            dimension_semantics=("parallel", "parallel", "arbitrary"),
            vmem_limit_bytes=vmem_limit_bytes),
        cost_estimate=pl.CostEstimate(flops=int(flops), transcendentals=0,
                                      bytes_accessed=int(bytes_accessed)),
    )(sp, ev_t, mask)

    # Back to the PyTorch output layout (B, N, 3, H).
    return jnp.transpose(v_dnh, (0, 2, 1, 3))


def cfconv_s2v_reference(s, ev, mask, weight, bias):
    """Pure-JAX reference mirroring the PyTorch forward (f32 math)."""
    s = s.astype(jnp.float32)
    ev = ev.astype(jnp.float32)
    mask = mask.astype(jnp.float32)
    y = s @ weight.T + bias
    mu = jnp.mean(y, axis=-1, keepdims=True)
    var = jnp.mean((y - mu) ** 2, axis=-1, keepdims=True)
    y = (y - mu) * jax.lax.rsqrt(var + 1e-5)
    y = y * jax.nn.sigmoid(y)
    t = y[:, None, :, :] * mask                                           # (B, N, N, H)
    v = jnp.sum(t[:, :, :, None, :] * ev[:, :, :, :, None], axis=2)       # (B, N, 3, H)
    return v


if __name__ == "__main__":
    B, N, H = 2, 8, 32
    key = jax.random.PRNGKey(0)
    k_s, k_ev, k_mask, k_w, k_b = jax.random.split(key, 5)

    s = jax.random.normal(k_s, (B, N, H), dtype=jnp.float32)
    ev = jax.random.normal(k_ev, (B, N, N, 3), dtype=jnp.float32)
    # 0/1 mask stored in bf16 (exact) to exercise the low-HBM-traffic path.
    mask = (jax.random.uniform(k_mask, (B, N, N, H)) > 0.5).astype(jnp.bfloat16)

    # Deterministic synthetic parameters for lin1's Linear(H, H).
    weight = jax.random.normal(k_w, (H, H), dtype=jnp.float32) * (1.0 / np.sqrt(H))
    bias = jax.random.normal(k_b, (H,), dtype=jnp.float32) * 0.01

    v = cfconv_s2v(s, ev, mask, weight, bias)
    v = jax.block_until_ready(v)

    v_ref = cfconv_s2v_reference(s, ev, mask, weight, bias)
    np.testing.assert_allclose(np.asarray(v), np.asarray(v_ref), rtol=1e-4, atol=1e-4)

    print("KERNEL_OK")
</pallas_src>

<mosaic_0001>
module attributes {stable_mosaic.version = 11 : i64} {
  func.func @_lin1_kernel(%arg0: i32, %arg1: memref<32x32xf32, #tpu.memory_space<vmem>>, %arg2: memref<1x32xf32, #tpu.memory_space<vmem>>, %arg3: memref<1x8x32xf32, #tpu.memory_space<vmem>>, %arg4: memref<1x8x32xf32, #tpu.memory_space<vmem>>) attributes {dimension_semantics = [#tpu.dimension_semantics<parallel>], iteration_bounds = array<i64: 2>, scalar_prefetch = 0 : i64, scratch_operands = 0 : i64, tpu.core_type = #tpu.core_type<tc>, window_params = [{pipeline_mode = #tpu.pipeline_mode<synchronous>, transform_indices = @transform_0, window_bounds = array<i64: 32, 32>}, {pipeline_mode = #tpu.pipeline_mode<synchronous>, transform_indices = @transform_1, window_bounds = array<i64: 1, 32>}, {transform_indices = @transform_2, window_bounds = array<i64: 1, 8, 32>}, {transform_indices = @transform_3, window_bounds = array<i64: 1, 8, 32>}]} {
    %c0 = arith.constant 0 : index
    %c0_0 = arith.constant 0 : index
    %c0_1 = arith.constant 0 : index
    %0 = vector.load %arg3[%c0, %c0_0, %c0_1] : memref<1x8x32xf32, #tpu.memory_space<vmem>>, vector<1x8x32xf32>
    %1 = vector.shape_cast %0 : vector<1x8x32xf32> to vector<8x32xf32>
    %c0_2 = arith.constant 0 : index
    %c0_3 = arith.constant 0 : index
    %2 = vector.load %arg1[%c0_2, %c0_3] : memref<32x32xf32, #tpu.memory_space<vmem>>, vector<32x32xf32>
    %cst = arith.constant dense<0.000000e+00> : vector<8x32xf32>
    %3 = tpu.matmul %1, %2, %cst {dimension_numbers = #tpu.dot_dimension_numbers<[1], [0], [0], [1], [0, 0, 1, 1], [], []>} : vector<8x32xf32>, vector<32x32xf32>, vector<8x32xf32> -> vector<8x32xf32>
    %c0_4 = arith.constant 0 : index
    %c0_5 = arith.constant 0 : index
    %4 = vector.load %arg2[%c0_4, %c0_5] : memref<1x32xf32, #tpu.memory_space<vmem>>, vector<1x32xf32>
    %5 = vector.broadcast %4 : vector<1x32xf32> to vector<8x32xf32>
    %6 = arith.addf %3, %5 : vector<8x32xf32>
    %cst_6 = arith.constant dense<0.000000e+00> : vector<8xf32>
    %7 = vector.multi_reduction <add>, %6, %cst_6 [1] : vector<8x32xf32> to vector<8xf32>
    %8 = vector.shape_cast %7 : vector<8xf32> to vector<8x1xf32>
    %cst_7 = arith.constant 3.200000e+01 : f32
    %9 = vector.broadcast %cst_7 : f32 to vector<8x1xf32>
    %10 = arith.divf %8, %9 : vector<8x1xf32>
    %11 = vector.broadcast %10 : vector<8x1xf32> to vector<8x32xf32>
    %12 = arith.subf %6, %11 : vector<8x32xf32>
    %13 = vector.broadcast %10 : vector<8x1xf32> to vector<8x32xf32>
    %14 = arith.subf %6, %13 : vector<8x32xf32>
    %15 = arith.mulf %12, %14 : vector<8x32xf32>
    %cst_8 = arith.constant dense<0.000000e+00> : vector<8xf32>
    %16 = vector.multi_reduction <add>, %15, %cst_8 [1] : vector<8x32xf32> to vector<8xf32>
    %17 = vector.shape_cast %16 : vector<8xf32> to vector<8x1xf32>
    %cst_9 = arith.constant 3.200000e+01 : f32
    %18 = vector.broadcast %cst_9 : f32 to vector<8x1xf32>
    %19 = arith.divf %17, %18 : vector<8x1xf32>
    %20 = vector.broadcast %10 : vector<8x1xf32> to vector<8x32xf32>
    %21 = arith.subf %6, %20 : vector<8x32xf32>
    %cst_10 = arith.constant 9.99999974E-6 : f32
    %22 = vector.broadcast %cst_10 : f32 to vector<8x1xf32>
    %23 = arith.addf %19, %22 : vector<8x1xf32>
    %24 = math.rsqrt %23 : vector<8x1xf32>
    %25 = vector.broadcast %24 : vector<8x1xf32> to vector<8x32xf32>
    %26 = arith.mulf %21, %25 : vector<8x32xf32>
    %27 = arith.negf %26 : vector<8x32xf32>
    %28 = math.exp %27 : vector<8x32xf32>
    %cst_11 = arith.constant 1.000000e+00 : f32
    %29 = vector.broadcast %cst_11 : f32 to vector<8x32xf32>
    %30 = arith.addf %29, %28 : vector<8x32xf32>
    %31 = arith.divf %29, %30 : vector<8x32xf32>
    %32 = arith.mulf %26, %31 : vector<8x32xf32>
    %c0_12 = arith.constant 0 : index
    %c0_13 = arith.constant 0 : index
    %c0_14 = arith.constant 0 : index
    %33 = vector.load %arg4[%c0_12, %c0_13, %c0_14] : memref<1x8x32xf32, #tpu.memory_space<vmem>>, vector<1x8x32xf32>
    %34 = vector.shape_cast %33 : vector<1x8x32xf32> to vector<8x32xf32>
    %35 = vector.shape_cast %32 : vector<8x32xf32> to vector<1x8x32xf32>
    tpu.vector_store %arg4[%c0_12, %c0_13, %c0_14], %35 {strides = array<i32>} : memref<1x8x32xf32, #tpu.memory_space<vmem>>, vector<1x8x32xf32>,
    return
  }
  func.func @transform_0(%arg0: i32) -> (i32, i32) {
    %c0_i32 = arith.constant 0 : i32
    %c0_i32_0 = arith.constant 0 : i32
    %c0_i32_1 = arith.constant 0 : i32
    return %c0_i32, %c0_i32_0 : i32, i32
  }
  func.func @transform_1(%arg0: i32) -> (i32, i32) {
    %c0_i32 = arith.constant 0 : i32
    %c0_i32_0 = arith.constant 0 : i32
    %c0_i32_1 = arith.constant 0 : i32
    return %c0_i32, %c0_i32_0 : i32, i32
  }
  func.func @transform_2(%arg0: i32) -> (i32, i32, i32) {
    %c0_i32 = arith.constant 0 : i32
    %c0_i32_0 = arith.constant 0 : i32
    %c0_i32_1 = arith.constant 0 : i32
    return %arg0, %c0_i32, %c0_i32_0 : i32, i32, i32
  }
  func.func @transform_3(%arg0: i32) -> (i32, i32, i32) {
    %c0_i32 = arith.constant 0 : i32
    %c0_i32_0 = arith.constant 0 : i32
    %c0_i32_1 = arith.constant 0 : i32
    return %arg0, %c0_i32, %c0_i32_0 : i32, i32, i32
  }
}

</mosaic_0001>

<bundles_post_ra>
// kernel: tpu_custom_call.1
= control target key start
LH: loop header
LB: loop body
LE: loop exit
PB: predicated region body
PF: predicated region fallthrough
CT: control target
= control target key end

     0   :  { %8 = vsyncpa [#allocation3], 0  ;;  %s877_s0 = inlined_call_operand.hbm [shape: f32[32,32], index: 0, kind: input, shape index: {}]   ;;  %s878_s1 = inlined_call_operand.vmem [shape: f32[1,32], index: 1, kind: input, shape index: {}]   ;;  %s879_s2 = inlined_call_operand.hbm [shape: f32[2,8,32], index: 2, kind: input, shape index: {}]   ;;  %s880_s3 = inlined_call_operand.hbm [shape: f32[2,8,32], index: 3, kind: output, shape index: {}]  }
   0x1   :  { %9 = vsyncpa [#allocation6], 0 }
   0x2   :  { %11 = vsyncpa [#allocation6 + $0x1], 0 }
   0x3   :  { %12 = vsyncpa [#allocation4], 0 }
   0x4   :  { %14 = vsyncpa [#allocation4 + $0x1], 0  ;;  %s670_s12 = smov 0   ;;  %s672_s13 = smov 0  }
   0x5   :  { %s674_s14 = smov 0   ;;  %s676_s15 = smov 0  }
   0x6 LB: > { %s691_s16 = sadd.s32 4294967295, %s640_s15   ;;  %s405_s17 = sadd.s32 4294967294, %s640_s15   ;;  %s640_s15 = sphi %s676_s15, %s900_s15   ;;  %s636_s14 = sphi %s674_s14, %s899_s14   ;;  %s632_s13 = sphi %s672_s13, %s898_s13   ;;  %s628_s12 = sphi %s670_s12, %s897_s12  }
   0x7   : > { %p82_p0 = scmp.ne.s32.totalorder %s632_s13, %s628_s12  ;;  %p881_p1 = scmp.eq.s32.totalorder %s691_s16, 0 }
   0x8   : > { %p112_p3 = scmp.eq.s32.totalorder %s405_s17, 1  ;;  %p406_p5 = scmp.ge.s32.totalorder %s640_s15, 1 }
   0x9   : > { %p700_p4 = por %p881_p1, %p82_p0  ;;  %p119_p7 = scmp.lt.s32.totalorder %s640_s15, 3 }
   0xa   : > { %p705_p6 = por %p112_p3, %p82_p0  ;;  %s642_s21 = smov [#allocation2]  }
   0xb   : > { %s884_s18 = scalar_select %p700_p4, 1, 0 }
   0xc   : > { %s885_s19 = scalar_select %p705_p6, 1, 0 }
   0xd   : > { %p710_p8 = pnand %p406_p5, %p119_p7  ;;  %s131_s22 = sshll.u32 %s642_s21, 4  ;;  %s714_s22 = int_to_ptr.vmem [resolvable:$true] %s131_s22 }
   0xe   : > { %s726_s24 = sadd.s32 1, %s640_s15   ;;  %s69_s25 = sadd.s32 1, %s636_s14 }
   0xf   : > { %s886_s20 = scalar_select %p710_p8, 1, 0 }
  0x10   : > { %p452_p9 = pneg %p710_p8  ;;  %s66_s26 = ssub.s32 %s640_s15, %s726_s24 }
  0x11   : > { %s512_s29 = scalar_lea.hbm %s877_s0, 512 }
  0x12   : > { %p721_p11 = pnand %p452_p9, %p881_p1  ;;  %p513_p12 = scmp.ne.s32.totalorder %s877_s0, %s512_s29 }
  0x13   : > { %p519_p5 = scmp.lt.u32.totalorder %s512_s29, %s877_s0 }
  0x14   : > { %p514_p13 = pneg %p721_p11 }
  0x16   : > { %p515_p0 = pnand %p514_p13, %p513_p12 }
  0x18   : > { %p516_p3 = pneg %p515_p0 }
  0x1a   : > { %p521_p7 = pnand %p519_p5, %p516_p3 }
  0x1c   : > { %524 = shalt.err (!%p521_p7)
}
  0x1d   : > { %s525_s7 = scalar_lea.vmem %s714_s22, 512  ;;  %p533_p2 = scmp.lt.s32.totalorder %s714_s22, %s714_s22 }
  0x1e   : > { %p526_p9 = scmp.ne.s32.totalorder %s714_s22, %s525_s7  ;;  %p534_p6 = scmp.lt.s32.totalorder %s525_s7, %s525_s7 }
  0x20   : > { %p528_p10 = pnand %p526_p9, %p514_p13  ;;  %p535_p4 = por %p534_p6, %p533_p2 }
  0x22   : > { %p529_p1 = pneg %p528_p10 }
  0x24   : > { %p536_p8 = pnand %p535_p4, %p529_p1 }
  0x26   : > { %539 = shalt.err (!%p536_p8)
}
  0x27   : > { %s643_s8 = smov 128   ;;  %s644_s9 = smov 8  }
  0x28   : > { %455 = dma.hbm_to_vmem [thread:$0]  (!%p721_p11), %s877_s0, 512, %s714_s22, [#allocation3], %s643_s8, %s643_s8, %s644_s9  }
  0x29   : > { %p67_p2 = scmp.eq.s32.totalorder %s66_s26, 0  ;;  %p76_p1 = scmp.ne.s32.totalorder %s636_s14, %s632_s13 }
  0x2a   : > { %p77_p4 = scmp.eq.s32.totalorder %s640_s15, 0  ;;  %p465_p6 = scmp.lt.s32.totalorder %s640_s15, 2 }
  0x2b   : > { %s757_s17 = scalar_select %p67_p2, %s636_s14, %s69_s25  }
  0x2c   : > { %p78_p8 = por %p77_p4, %p76_p1  ;;  %p888_p10 = scmp.eq.s32.totalorder %s691_s16, 1 }
  0x2d   : > { %s148_s27 = sand.u32 1, %s636_s14   ;;  %s410_s28 = sshll.u32 %s640_s15, 7 }
  0x2e   : > { %p761_p12 = por %p888_p10, %p76_p1  ;;  %s409_s29 = sshll.u32 %s148_s27, 3 }
  0x2f   : > { %s770_s4 = scalar_lea.hbm %s879_s2, %s410_s28  ;;  %s152_s22 = scalar_lea.vmem [#allocation5], %s409_s29 }
  0x30   : > { %s159_s25 = sshll.u32 %s152_s22, 4  ;;  %p772_p11 = pnand %p465_p6, %p78_p8  ;;  %s776_s25 = int_to_ptr.vmem [resolvable:$true] %s159_s25 }
  0x31   : > { %s149_s5 = scalar_lea.sflag [#allocation6], %s148_s27  ;;  %s540_s6 = scalar_lea.hbm %s770_s4, 128 }
  0x32   : > { %p541_p13 = scmp.ne.s32.totalorder %s770_s4, %s540_s6  ;;  %p542_p0 = pneg %p772_p11 }
  0x33   : > { %s545_s9 = scalar_lea.hbm %s879_s2, 256  ;;  %p546_p7 = scmp.lt.u32.totalorder %s770_s4, %s879_s2 }
  0x34   : > { %p543_p3 = pnand %p542_p0, %p541_p13  ;;  %p547_p9 = scmp.lt.u32.totalorder %s545_s9, %s540_s6 }
  0x35   : > { %p549_p1 = scmp.lt.u32.totalorder %s540_s6, %s770_s4 }
  0x36   : > { %p544_p5 = pneg %p543_p3  ;;  %p548_p2 = por %p547_p9, %p546_p7 }
  0x38   : > { %p550_p4 = por %p549_p1, %p548_p2 }
  0x3a   : > { %p551_p6 = pnand %p550_p4, %p544_p5 }
  0x3c   : > { %554 = shalt.err (!%p551_p6)
}
  0x3d   : > { %s555_s27 = scalar_lea.vmem %s776_s25, 128  ;;  %s645_s28 = smov [#allocation5]  }
  0x3e   : > { %p556_p8 = scmp.ne.s32.totalorder %s776_s25, %s555_s27  ;;  %s560_s29 = sshll.u32 %s645_s28, 4  ;;  %s561_s29 = int_to_ptr.vmem [resolvable:$false] %s560_s29 }
  0x3f   : > { %s562_s23 = scalar_lea.vmem %s561_s29, 256  ;;  %p563_p3 = scmp.lt.s32.totalorder %s776_s25, %s561_s29 }
  0x40   : > { %p558_p10 = pnand %p556_p8, %p542_p0  ;;  %p564_p7 = scmp.lt.s32.totalorder %s562_s23, %s555_s27 }
  0x42   : > { %p559_p13 = pneg %p558_p10  ;;  %p565_p9 = por %p564_p7, %p563_p3 }
  0x44   : > { %p566_p2 = pnand %p565_p9, %p559_p13 }
  0x46   : > { %569 = shalt.err (!%p566_p2)
}
  0x47   : > { %459 = dma.hbm_to_vmem [thread:$0]  (!%p772_p11), %s770_s4, 128, %s776_s25, %s149_s5  }
  0x48   : > { %p891_p5 = scmp.ne.s32.totalorder %s886_s20, 0 }
  0x49   : > { %p892_p0 = scmp.eq.s32.totalorder (!%p891_p5), %s691_s16, 0 }
  0x4a   : > { %168 = sbr.rel (%p891_p5) target bundleno = 661 (0x295), region = 32 }
  0x51   : > { %615 = dma.done.wait (%p892_p0), [#allocation3], 512   ;;  %p893_p1 = pmov %p892_p0 }
  0x52   : > { %s810_s30 = sand.u32 1, %s632_s13   ;;  %p894_p11 = scmp.ne.s32.totalorder %s884_s18, 0 }
  0x53   : > { %617 = vsyncadd (%p893_p1), [#allocation3], 4294966784  ;;  %s413_s22 = sshll.u32 %s810_s30, 3  ;;  %s175_s26 = scalar_lea.sflag [#allocation6], %s810_s30 }
  0x54   : > { %s178_s4 = scalar_lea.vmem [#allocation5], %s413_s22 }
  0x55   : > { %619 = dma.done.wait (%p894_p11), %s175_s26, 128  }
  0x56   : > { %621 = vsyncadd (%p894_p11), %s175_s26, 4294967168  ;;  %v646_v0 = vmov 0.0|0.0   ;;  %vm647_vm0 = vmmov 0   ;;  %v648_v1 = vmov 0.0   ;;  %v202_v2 = vld [vmem:[#allocation2] sm:$0xff]  ;;  %v203_v3 = vld [vmem:[#allocation2 + $0x8] sm:$0xff] }
  0x57   : > { %438 = vmatprep.subr.bf16.mxu0 %v646_v0  ;;  %435 = vmatprep.mubr.msk.f32.mxu0 %vm647_vm0, %v648_v1  ;;  %v204_v4 = vld [vmem:[#allocation2 + $0x10] sm:$0xff]  ;;  %v439_v5 = vpack.c.bf16 %v203_v3, %v202_v2  ;;  %v205_v6 = vld [vmem:[#allocation2 + $0x18] sm:$0xff]  ;;  %v201_v8 = vld [vmem:[%s178_s4] sm:$0xff]  ;;  %vm213_vm1 = vcmask 261120   ;;  %s419_s25 = sshll.u32 %s691_s16, 7  ;;  %s200_s5 = scalar_lea.vmem [#allocation7], %s413_s22 }
  0x58   : > { %v442_v7 = vpack.c.bf16 %v205_v6, %v204_v4  ;;  %v415_v9 = vld [vmem:[%s878_s1] ss:$0 sm:$0xff]  ;;  %s323_s6 = sshll.u32 %s200_s5, 4  ;;  %s832_s9 = scalar_lea.hbm %s880_s3, %s419_s25  ;;  %s834_s6 = int_to_ptr.vmem [resolvable:$true] %s323_s6 }
  0x59   : > { %440 = vmatpush3.bf16.msra.mxu0 %v439_v5  ;;  %s310_s10 = scalar_lea.sflag [#allocation4], %s810_s30  ;;  %s570_s11 = scalar_lea.vmem %s834_s6, 128 }
  0x5a   : > { %441 = vmatprep.subr.bf16.mxu0 %v646_v0  ;;  %p571_p4 = scmp.ne.s32.totalorder %s834_s6, %s570_s11  ;;  %s649_s16 = smov [#allocation7]  }
  0x5b   : > { %s574_s27 = sshll.u32 %s649_s16, 4  ;;  %s575_s27 = int_to_ptr.vmem [resolvable:$false] %s574_s27 }
  0x5c   : > { %p572_p6 = pnand %p571_p4, %p761_p12  ;;  %s576_s28 = scalar_lea.vmem %s575_s27, 256 }
  0x5d   : > { %443 = vmatpush3.bf16.msra.mxu0 %v442_v7  ;;  %p577_p10 = scmp.lt.s32.totalorder %s834_s6, %s575_s27  ;;  %p578_p13 = scmp.lt.s32.totalorder %s576_s28, %s570_s11 }
  0x5e   : > { %p573_p8 = pneg %p572_p6 }
  0x5f   : > { %p579_p3 = por %p578_p13, %p577_p10 }
  0x60   : > { %436 = vmatmul.mubr.msk.f32.vlgmr.msra.gmra.mrb[0].mxu0 %vm213_vm1, %v201_v8 }
  0x61   : > { %p580_p7 = pnand %p579_p3, %p573_p8 }
 0x133   : > { %v283_v10 = vpop.f32.mrb[0].mxu0 }
 0x134   : > { %v284_v11 = vadd.f32 %v415_v9, %v283_v10  ;;  %v437_v12 = vpop.f32.mrb[1].mxu0 }
 0x136   : > { %v287_v13 = vsel %vm213_vm1, %v284_v11, 0.0 }
 0x137   : > { %288 = vadd.xlane.f32.xlu0 %v287_v13 }
 0x1c4   : > { %v289_v14 = vpop.xlane.xlu0 %288 }
 0x1c5   : > { %v291_v15 = vmul.f32 0.03125, %v289_v14 }
 0x1c7   : > { %v292_v16 = vsub.f32 %v284_v11, %v291_v15 }
 0x1c9   : > { %v293_v17 = vmul.f32 %v292_v16, %v292_v16 }
 0x1cb   : > { %v294_v18 = vsel %vm213_vm1, %v293_v17, 0.0 }
 0x1cc   : > { %295 = vadd.xlane.f32.xlu0 %v294_v18 }
 0x259   : > { %v296_v19 = vpop.xlane.xlu0 %295 }
 0x25a   : > { %v297_v20 = vmul.f32 0.03125, %v296_v19 }
 0x25c   : > { %v298_v21 = vadd.f32 1e-05, %v297_v20 }
 0x25e   : > { %506 = vrsqrt.f32 %v298_v21 }
 0x268   : > { %v507_v22 = vpop.eup %506 }
 0x269   : > { %v300_v23 = vmul.f32 %v507_v22, %v292_v16 }
 0x26b   : > { %v417_v24 = vmul.f32 -1.442695, %v300_v23 }
 0x26d   : > { %508 = vpow2.f32 %v417_v24 }
 0x277   : > { %v509_v25 = vpop.eup %508 }
 0x278   : > { %v304_v26 = vadd.f32 1.0, %v509_v25 }
 0x27a   : > { %510 = vrcp.f32 %v304_v26 }
 0x284   : > { %v511_v27 = vpop.eup %510 }
 0x285   : > { %v307_v28 = vmul.f32 %v511_v27, %v300_v23 }
 0x287   : > { %308 = vst.msk [vmem:[%s200_s5] sm:$0xff] %vm213_vm1, %v307_v28 }
 0x288   : > { %583 = shalt.err (!%p580_p7)
}
 0x289   : > { %s584_s29 = scalar_lea.hbm %s832_s9, 128  ;;  %s588_s22 = scalar_lea.hbm %s880_s3, 256 }
 0x28a   : > { %p585_p9 = scmp.ne.s32.totalorder %s832_s9, %s584_s29  ;;  %p589_p0 = scmp.lt.u32.totalorder %s832_s9, %s880_s3 }
 0x28b   : > { %p590_p1 = scmp.lt.u32.totalorder %s588_s22, %s584_s29  ;;  %p592_p4 = scmp.lt.u32.totalorder %s584_s29, %s832_s9 }
 0x28c   : > { %p586_p2 = pnand %p585_p9, %p761_p12 }
 0x28d   : > { %p591_p11 = por %p590_p1, %p589_p0 }
 0x28e   : > { %p587_p5 = pneg %p586_p2 }
 0x28f   : > { %p593_p6 = por %p592_p4, %p591_p11 }
 0x291   : > { %p594_p8 = pnand %p593_p6, %p587_p5 }
 0x293   : > { %597 = shalt.err (!%p594_p8)
}
 0x294   : > { %450 = dma.vmem_to_hbm [thread:$0]  (%p761_p12), %s834_s6, 128, %s832_s9, %s310_s10  }
 0x295 PF: > { %s335_s18 = sand.u32 1, %s628_s12   ;;  %p895_p10 = scmp.ne.s32.totalorder %s885_s19, 0 }
 0x296   : > { %p896_p13 = scmp.ge.s32.totalorder %s640_s15, 2  ;;  %s336_s20 = scalar_lea.sflag [#allocation4], %s335_s18 }
 0x298   : > { %p461_p3 = pnand %p896_p13, %p895_p10 }
 0x29a   : > { %623 = dma.done.wait (!%p461_p3), %s336_s20, 128  }
 0x29b   : > { %625 = vsyncadd (!%p461_p3), %s336_s20, 4294967168  ;;  %p17_p7 = scmp.ge.s32.totalorder %s726_s24, 4   ;;  %s897_s12 = smov %s632_s13 }
 0x29c   : > { %s898_s13 = smov %s636_s14  ;;  %s899_s14 = smov %s757_s17 }
 0x29d   : > { %s900_s15 = smov %s726_s24  ;;  %19 = sbr.rel (!%p17_p7) target bundleno = 6 (0x6), region = 82 }
 0x2a4   :  { %341 = vsyncpa [#allocation3], 1 }
 0x2a5   :  { %343 = vsyncpa [#allocation3 + $0x1], 1 }
 0x2a6   :  { %344 = vsyncpa [#allocation6], 1 }
 0x2a7   :  { %346 = vsyncpa [#allocation6 + $0x1], 1 }
 0x2a8   :  { %347 = vsyncpa [#allocation4], 1 }
 0x2a9   :  { %349 = vsyncpa [#allocation4 + $0x1], 1 }

</bundles_post_ra>
